<compile_context>
chip_gen: v6e
topology: v6e:2x2x1
jax: 0.10.0
libtpu: 0.0.40
codegen_flags: <defaults>
</compile_context>

<pallas_src>
import functools

import jax
import jax.numpy as jnp
from jax.experimental import pallas as pl
from jax.experimental.pallas import tpu as pltpu

SEQ = 196          # MaxPool1d(kernel_size=196) => sequence length must be 196
IN_DIM = 256
HIDDEN_DIM = 512
OUTPUT_DIM = 8
BATCH = 2


def _datation_kernel(x_ref, w1_ref, b1_ref, w2_ref, b2_ref, o_ref, *,
                     batch, in_dim):
    # x_ref: (SEQ, batch*in_dim) f32 — row-major flatten of the (S, B, C)
    # input. Max-pool in the input precision (f32); each batch element is a
    # lane-aligned 256-wide slab (multiples of 128), reduced over sublanes.
    rows = [jnp.max(x_ref[:, b * in_dim:(b + 1) * in_dim], axis=0, keepdims=True)
            for b in range(batch)]                                # each (1, C) f32
    pooled = jnp.concatenate(rows, axis=0)                        # (B, C) f32

    # fc1 + ReLU: only the tiny pooled tensor is rounded to bf16 (w1 is
    # pre-cast once outside the call path); f32 accumulation on the MXU.
    h = jnp.dot(pooled.astype(jnp.bfloat16), w1_ref[...],
                preferred_element_type=jnp.float32) + b1_ref[...]  # (B, HIDDEN)
    h = jnp.maximum(h, 0.0)

    # fc2: small (HIDDEN, out_dim) f32 weight read as-is; the (B, out_dim)
    # masked store is cheaper than padding w2/out to 128 lanes in HBM.
    o_ref[...] = (jnp.dot(h, w2_ref[...], preferred_element_type=jnp.float32)
                  + b2_ref[...]).astype(o_ref.dtype)               # (B, out_dim)


@jax.jit
def datation_forward(x, w1_bf16, b1, w2, b2):
    """x: (SEQ, B, IN_DIM) float32, exactly as the PyTorch module receives it.

    w1_bf16 must already be bf16 (see prepare_params); all other params f32.
    """
    S, B, C = x.shape
    assert S == SEQ, f"MaxPool1d(196) requires sequence length 196, got {S}"
    assert C == IN_DIM
    out_dim = w2.shape[1]

    # Free (metadata-only) row-major flatten; no transpose, no dtype cast.
    x2 = x.reshape(S, B * C)                                       # (196, B*C)

    # True HBM traffic for the single kernel invocation.
    hbm_bytes = (x.size * x.dtype.itemsize          # x read (f32)
                 + w1_bf16.size * 2 + b1.size * 4   # weights/bias fc1
                 + w2.size * 4 + b2.size * 4        # weights/bias fc2
                 + B * out_dim * 4)                 # output write
    cost = pl.CostEstimate(
        flops=2 * B * (C * HIDDEN_DIM + HIDDEN_DIM * out_dim),
        transcendentals=0,
        bytes_accessed=hbm_bytes,
    )

    # Single invocation, no grid: ~1 MB total incl. tile padding, far below
    # the scoped VMEM default (16/32 MiB) on every generation.
    # TODO(synk): if B grows, add a batch grid axis marked "parallel" (shards
    # across v7x's 2 TensorCores), keep weights resident via constant-index
    # BlockSpecs, budget tiles against v7x's 64 MiB physical / 32 MiB scoped
    # VMEM, and pad/accumulate M >= 8 before expecting MXU-bound behavior.

    kernel = functools.partial(_datation_kernel, batch=B, in_dim=C)
    return pl.pallas_call(
        kernel,
        out_shape=jax.ShapeDtypeStruct((B, out_dim), jnp.float32),
        in_specs=[pl.BlockSpec(memory_space=pltpu.MemorySpace.VMEM)] * 5,
        out_specs=pl.BlockSpec(memory_space=pltpu.MemorySpace.VMEM),
        cost_estimate=cost,
    )(x2, w1_bf16, b1, w2, b2)


def init_params(key):
    """Deterministic init mimicking nn.Linear defaults (uniform +/- 1/sqrt(fan_in))."""
    k1, k2, k3, k4 = jax.random.split(key, 4)
    lim1 = 1.0 / jnp.sqrt(jnp.float32(IN_DIM))
    lim2 = 1.0 / jnp.sqrt(jnp.float32(HIDDEN_DIM))
    # Stored already transposed for y = x @ W + b.
    w1 = jax.random.uniform(k1, (IN_DIM, HIDDEN_DIM), jnp.float32, -lim1, lim1)
    b1 = jax.random.uniform(k2, (1, HIDDEN_DIM), jnp.float32, -lim1, lim1)
    w2 = jax.random.uniform(k3, (HIDDEN_DIM, OUTPUT_DIM), jnp.float32, -lim2, lim2)
    b2 = jax.random.uniform(k4, (1, OUTPUT_DIM), jnp.float32, -lim2, lim2)
    return w1, b1, w2, b2


def prepare_params(w1):
    """One-time weight preprocessing, hoisted out of the per-forward path."""
    return w1.astype(jnp.bfloat16)


def reference_forward(x, w1, b1, w2, b2):
    """Pure-f32 JAX reference of the PyTorch forward."""
    pooled = jnp.max(x, axis=0)                      # (B, IN_DIM)
    h = jnp.maximum(pooled @ w1 + b1, 0.0)
    return h @ w2 + b2


if __name__ == "__main__":
    key = jax.random.PRNGKey(0)
    kx, kp = jax.random.split(key)
    x = jax.random.normal(kx, (SEQ, BATCH, IN_DIM), jnp.float32)
    w1, b1, w2, b2 = init_params(kp)
    w1_bf16 = prepare_params(w1)   # once, outside the forward path

    out = datation_forward(x, w1_bf16, b1, w2, b2)
    out = jax.block_until_ready(out)

    ref = reference_forward(x, w1, b1, w2, b2)
    assert out.shape == (BATCH, OUTPUT_DIM)
    # Pool is in f32; only the fc1 operands (pooled, w1) are bf16-rounded with
    # f32 accumulation, so a modest tolerance vs the f32 reference suffices.
    assert jnp.allclose(out, ref, atol=2e-2, rtol=2e-2), "mismatch vs reference"

    print("KERNEL_OK")
</pallas_src>

<mosaic_0001>
module attributes {stable_mosaic.version = 11 : i64} {
  func.func @_datation_kernel(%arg0: memref<196x512xf32, #tpu.memory_space<vmem>>, %arg1: memref<256x512xbf16, #tpu.memory_space<vmem>>, %arg2: memref<1x512xf32, #tpu.memory_space<vmem>>, %arg3: memref<512x8xf32, #tpu.memory_space<vmem>>, %arg4: memref<1x8xf32, #tpu.memory_space<vmem>>, %arg5: memref<2x8xf32, #tpu.memory_space<vmem>>) attributes {dimension_semantics = [], scalar_prefetch = 0 : i64, scratch_operands = 0 : i64, tpu.core_type = #tpu.core_type<tc>} {
    %c0 = arith.constant 0 : index
    %c0_0 = arith.constant 0 : index
    %0 = vector.load %arg0[%c0, %c0_0] : memref<196x512xf32, #tpu.memory_space<vmem>>, vector<196x256xf32>
    %cst = arith.constant dense<0xFF800000> : vector<256xf32>
    %1 = vector.multi_reduction <maximumf>, %0, %cst [0] : vector<196x256xf32> to vector<256xf32>
    %2 = vector.shape_cast %1 : vector<256xf32> to vector<1x256xf32>
    %c0_1 = arith.constant 0 : index
    %c256 = arith.constant 256 : index
    %3 = vector.load %arg0[%c0_1, %c256] : memref<196x512xf32, #tpu.memory_space<vmem>>, vector<196x256xf32>
    %cst_2 = arith.constant dense<0xFF800000> : vector<256xf32>
    %4 = vector.multi_reduction <maximumf>, %3, %cst_2 [0] : vector<196x256xf32> to vector<256xf32>
    %5 = vector.shape_cast %4 : vector<256xf32> to vector<1x256xf32>
    %6 = tpu.concatenate %2, %5 in 0 : vector<1x256xf32>, vector<1x256xf32> -> vector<2x256xf32>
    %7 = arith.truncf %6 : vector<2x256xf32> to vector<2x256xbf16>
    %c0_3 = arith.constant 0 : index
    %c0_4 = arith.constant 0 : index
    %8 = vector.load %arg1[%c0_3, %c0_4] : memref<256x512xbf16, #tpu.memory_space<vmem>>, vector<256x512xbf16>
    %cst_5 = arith.constant dense<0.000000e+00> : vector<2x512xf32>
    %9 = tpu.matmul %7, %8, %cst_5 {dimension_numbers = #tpu.dot_dimension_numbers<[1], [0], [0], [1], [0, 0, 1, 1], [], []>} : vector<2x256xbf16>, vector<256x512xbf16>, vector<2x512xf32> -> vector<2x512xf32>
    %c0_6 = arith.constant 0 : index
    %c0_7 = arith.constant 0 : index
    %10 = vector.load %arg2[%c0_6, %c0_7] : memref<1x512xf32, #tpu.memory_space<vmem>>, vector<1x512xf32>
    %11 = vector.broadcast %10 : vector<1x512xf32> to vector<2x512xf32>
    %12 = arith.addf %9, %11 : vector<2x512xf32>
    %cst_8 = arith.constant 0.000000e+00 : f32
    %13 = vector.broadcast %cst_8 : f32 to vector<2x512xf32>
    %14 = arith.maximumf %12, %13 : vector<2x512xf32>
    %c0_9 = arith.constant 0 : index
    %c0_10 = arith.constant 0 : index
    %15 = vector.load %arg3[%c0_9, %c0_10] : memref<512x8xf32, #tpu.memory_space<vmem>>, vector<512x8xf32>
    %cst_11 = arith.constant dense<0.000000e+00> : vector<2x8xf32>
    %16 = tpu.matmul %14, %15, %cst_11 {dimension_numbers = #tpu.dot_dimension_numbers<[1], [0], [0], [1], [0, 0, 1, 1], [], []>} : vector<2x512xf32>, vector<512x8xf32>, vector<2x8xf32> -> vector<2x8xf32>
    %c0_12 = arith.constant 0 : index
    %c0_13 = arith.constant 0 : index
    %17 = vector.load %arg4[%c0_12, %c0_13] : memref<1x8xf32, #tpu.memory_space<vmem>>, vector<1x8xf32>
    %18 = vector.broadcast %17 : vector<1x8xf32> to vector<2x8xf32>
    %19 = arith.addf %16, %18 : vector<2x8xf32>
    %c0_14 = arith.constant 0 : index
    %c0_15 = arith.constant 0 : index
    %20 = vector.load %arg5[%c0_14, %c0_15] : memref<2x8xf32, #tpu.memory_space<vmem>>, vector<2x8xf32>
    tpu.vector_store %arg5[%c0_14, %c0_15], %19 {strides = array<i32>} : memref<2x8xf32, #tpu.memory_space<vmem>>, vector<2x8xf32>,
    return
  }
}

</mosaic_0001>

<bundles_post_ra>
// kernel: datation_forward.1
= control target key start
LH: loop header
LB: loop body
LE: loop exit
PB: predicated region body
PF: predicated region fallthrough
CT: control target
= control target key end

     0   :  { %vm93_vm0 = vcmask 1043456   ;;  %vm246_vm1 = vcmask 1040384   ;;  %s1954_s0 = inlined_call_operand.vmem [shape: f32[196,512], index: 0, kind: input, shape index: {}]   ;;  %s1955_s1 = inlined_call_operand.vmem [shape: bf16[256,512], index: 1, kind: input, shape index: {}]   ;;  %s1956_s2 = inlined_call_operand.vmem [shape: f32[1,512], index: 2, kind: input, shape index: {}]   ;;  %s1957_s3 = inlined_call_operand.vmem [shape: f32[512,8], index: 3, kind: input, shape index: {}]   ;;  %s1958_s4 = inlined_call_operand.vmem [shape: f32[1,8], index: 4, kind: input, shape index: {}]   ;;  %s1959_s5 = inlined_call_operand.hbm [shape: f32[2,8], index: 5, kind: output, shape index: {}]  }
   0x1   :  { %v1106_v0 = vld [vmem:[%s1955_s1 + $0xe4] ss:$16 sps:$4 sm:$0xff]   ;;  %v1108_v1 = vld [vmem:[%s1955_s1 + $0xec] ss:$16 sps:$4 sm:$0xff]   ;;  %v1110_v2 = vld [vmem:[%s1955_s1 + $0xe0] ss:$16 sps:$4 sm:$0xff]  }
   0x2   :  { %657 = vmatprep.subr.bf16.mxu0 %v1106_v0  ;;  %v1111_v3 = vld [vmem:[%s1955_s1 + $0xe8] ss:$16 sps:$4 sm:$0xff]   ;;  %698 = vmatprep.subr.bf16.mxu1 %v1108_v1  ;;  %v1112_v4 = vld [vmem:[%s1955_s1 + $0xc4] ss:$16 sps:$4 sm:$0xff]   ;;  %v1114_v5 = vld [vmem:[%s1955_s1 + $0xcc] ss:$16 sps:$4 sm:$0xff]  }
   0x3   :  { %658 = vmatpush1.bf16.msra.mxu0 %v1110_v2  ;;  %699 = vmatpush1.bf16.msra.mxu1 %v1111_v3  ;;  %v1116_v6 = vld [vmem:[%s1955_s1 + $0xc0] ss:$16 sps:$4 sm:$0xff]   ;;  %v1117_v7 = vld [vmem:[%s1955_s1 + $0xc8] ss:$16 sps:$4 sm:$0xff]   ;;  %v1118_v8 = vld [vmem:[%s1955_s1 + $0xa4] ss:$16 sps:$4 sm:$0xff]  }
   0x4   :  { %659 = vmatprep.subr.bf16.mxu0 %v1112_v4  ;;  %700 = vmatprep.subr.bf16.mxu1 %v1114_v5  ;;  %v1120_v9 = vld [vmem:[%s1955_s1 + $0xac] ss:$16 sps:$4 sm:$0xff]   ;;  %v1122_v10 = vld [vmem:[%s1955_s1 + $0xa0] ss:$16 sps:$4 sm:$0xff]   ;;  %v1123_v11 = vld [vmem:[%s1955_s1 + $0xa8] ss:$16 sps:$4 sm:$0xff]  }
   0x5   :  { %v1124_v12 = vld [vmem:[%s1955_s1 + $0x84] ss:$16 sps:$4 sm:$0xff]   ;;  %v1126_v13 = vld [vmem:[%s1955_s1 + $0x8c] ss:$16 sps:$4 sm:$0xff]   ;;  %v1128_v14 = vld [vmem:[%s1955_s1 + $0x80] ss:$16 sps:$4 sm:$0xff]  }
   0x6   :  { %v1129_v15 = vld [vmem:[%s1955_s1 + $0x88] ss:$16 sps:$4 sm:$0xff]   ;;  %v1130_v16 = vld [vmem:[%s1955_s1 + $0x64] ss:$16 sps:$4 sm:$0xff]   ;;  %v1132_v17 = vld [vmem:[%s1955_s1 + $0x6c] ss:$16 sps:$4 sm:$0xff]  }
   0x7   :  { %660 = vmatpush1.bf16.msra.mxu0 %v1116_v6  ;;  %701 = vmatpush1.bf16.msra.mxu1 %v1117_v7  ;;  %v1134_v18 = vld [vmem:[%s1955_s1 + $0x60] ss:$16 sps:$4 sm:$0xff]   ;;  %v1135_v19 = vld [vmem:[%s1955_s1 + $0x68] ss:$16 sps:$4 sm:$0xff]   ;;  %v1136_v20 = vld [vmem:[%s1955_s1 + $0x44] ss:$16 sps:$4 sm:$0xff]  }
   0x8   :  { %661 = vmatprep.subr.bf16.mxu0 %v1118_v8  ;;  %702 = vmatprep.subr.bf16.mxu1 %v1120_v9  ;;  %v1138_v21 = vld [vmem:[%s1955_s1 + $0x4c] ss:$16 sps:$4 sm:$0xff]   ;;  %v1140_v22 = vld [vmem:[%s1955_s1 + $0x40] ss:$16 sps:$4 sm:$0xff]   ;;  %v1141_v23 = vld [vmem:[%s1955_s1 + $0x48] ss:$16 sps:$4 sm:$0xff]  }
   0x9   :  { %v1142_v24 = vld [vmem:[%s1955_s1 + $0x24] ss:$16 sps:$4 sm:$0xff]   ;;  %v1144_v25 = vld [vmem:[%s1955_s1 + $0x2c] ss:$16 sps:$4 sm:$0xff]   ;;  %v1146_v26 = vld [vmem:[%s1955_s1 + $0x20] ss:$16 sps:$4 sm:$0xff]  }
   0xa   :  { %v1147_v27 = vld [vmem:[%s1955_s1 + $0x28] ss:$16 sps:$4 sm:$0xff]   ;;  %v1148_v28 = vld [vmem:[%s1955_s1 + $0x4] ss:$16 sps:$4 sm:$0xff]   ;;  %v1150_v29 = vld [vmem:[%s1955_s1 + $0xc] ss:$16 sps:$4 sm:$0xff]  }
   0xb   :  { %662 = vmatpush1.bf16.msra.mxu0 %v1122_v10  ;;  %703 = vmatpush1.bf16.msra.mxu1 %v1123_v11  ;;  %v1152_v30 = vld [vmem:[%s1955_s1] ss:$16 sps:$4 sm:$0xff]   ;;  %v1153_v31 = vld [vmem:[%s1955_s1 + $0x8] ss:$16 sps:$4 sm:$0xff]   ;;  %v1154_v32 = vld [vmem:[%s1955_s1 + $0x1e4] ss:$16 sps:$4 sm:$0xff]  }
   0xc   :  { %663 = vmatprep.subr.bf16.mxu0 %v1124_v12  ;;  %704 = vmatprep.subr.bf16.mxu1 %v1126_v13  ;;  %v1156_v33 = vld [vmem:[%s1955_s1 + $0x1ec] ss:$16 sps:$4 sm:$0xff]   ;;  %v1158_v34 = vld [vmem:[%s1955_s1 + $0x1e0] ss:$16 sps:$4 sm:$0xff]   ;;  %v1159_v35 = vld [vmem:[%s1955_s1 + $0x1e8] ss:$16 sps:$4 sm:$0xff]  }
   0xd   :  { %v1160_v36 = vld [vmem:[%s1955_s1 + $0x1c4] ss:$16 sps:$4 sm:$0xff]   ;;  %v1162_v37 = vld [vmem:[%s1955_s1 + $0x1cc] ss:$16 sps:$4 sm:$0xff]   ;;  %v1164_v38 = vld [vmem:[%s1955_s1 + $0x1c0] ss:$16 sps:$4 sm:$0xff]  }
   0xe   :  { %v1165_v39 = vld [vmem:[%s1955_s1 + $0x1c8] ss:$16 sps:$4 sm:$0xff]   ;;  %v1166_v40 = vld [vmem:[%s1955_s1 + $0x1a4] ss:$16 sps:$4 sm:$0xff]   ;;  %v1168_v41 = vld [vmem:[%s1955_s1 + $0x1ac] ss:$16 sps:$4 sm:$0xff]  }
   0xf   :  { %664 = vmatpush1.bf16.msra.mxu0 %v1128_v14  ;;  %705 = vmatpush1.bf16.msra.mxu1 %v1129_v15  ;;  %v1170_v42 = vld [vmem:[%s1955_s1 + $0x1a0] ss:$16 sps:$4 sm:$0xff]   ;;  %v1171_v43 = vld [vmem:[%s1955_s1 + $0x1a8] ss:$16 sps:$4 sm:$0xff]   ;;  %v1172_v44 = vld [vmem:[%s1955_s1 + $0x184] ss:$16 sps:$4 sm:$0xff]  }
  0x10   :  { %665 = vmatprep.subr.bf16.mxu0 %v1130_v16  ;;  %706 = vmatprep.subr.bf16.mxu1 %v1132_v17  ;;  %v1174_v45 = vld [vmem:[%s1955_s1 + $0x18c] ss:$16 sps:$4 sm:$0xff]   ;;  %v1176_v46 = vld [vmem:[%s1955_s1 + $0x180] ss:$16 sps:$4 sm:$0xff]   ;;  %v1177_v47 = vld [vmem:[%s1955_s1 + $0x188] ss:$16 sps:$4 sm:$0xff]  }
  0x11   :  { %v22_v48 = vld [vmem:[%s1954_s0 + $0x8] sm:$0xff]  ;;  %v1178_v52 = vld [vmem:[%s1955_s1 + $0x164] ss:$16 sps:$4 sm:$0xff]   ;;  %v1182_v0 = vld [vmem:[%s1955_s1 + $0x160] ss:$16 sps:$4 sm:$0xff]  }
  0x12   :  { %v24_v49 = vld [vmem:[%s1954_s0 + $0x28] sm:$0xff]  ;;  %v1184_v2 = vld [vmem:[%s1955_s1 + $0x144] ss:$16 sps:$4 sm:$0xff]   ;;  %v1188_v8 = vld [vmem:[%s1955_s1 + $0x140] ss:$16 sps:$4 sm:$0xff]  }
  0x13   :  { %666 = vmatpush1.bf16.msra.mxu0 %v1134_v18  ;;  %707 = vmatpush1.bf16.msra.mxu1 %v1135_v19  ;;  %v26_v50 = vld [vmem:[%s1954_s0 + $0x48] sm:$0xff]  ;;  %v1190_v14 = vld [vmem:[%s1955_s1 + $0x124] ss:$16 sps:$4 sm:$0xff]   ;;  %v135_v16 = vld [vmem:[%s1954_s0 + $0x18] sm:$0xff] }
  0x14   :  { %667 = vmatprep.subr.bf16.mxu0 %v1136_v20  ;;  %708 = vmatprep.subr.bf16.mxu1 %v1138_v21  ;;  %v28_v51 = vld [vmem:[%s1954_s0 + $0x68] sm:$0xff]  ;;  %v103_v55 = vmax.f32 %v22_v48, %v26_v50  ;;  %v137_v17 = vld [vmem:[%s1954_s0 + $0x38] sm:$0xff] }
  0x15   :  { %v30_v53 = vld [vmem:[%s1954_s0 + $0x88] sm:$0xff]  ;;  %v104_v56 = vmax.f32 %v24_v49, %v28_v51  ;;  %v139_v18 = vld [vmem:[%s1954_s0 + $0x58] sm:$0xff]  ;;  %v1200_v51 = vld [vmem:[%s1955_s1 + $0x100] ss:$16 sps:$4 sm:$0xff]  }
  0x16   :  { %v32_v54 = vld [vmem:[%s1954_s0 + $0xa8] sm:$0xff]  ;;  %v105_v60 = vmax.f32 %v103_v55, %v30_v53  ;;  %v141_v21 = vld [vmem:[%s1954_s0 + $0x78] sm:$0xff] }
  0x17   :  { %668 = vmatpush1.bf16.msra.mxu0 %v1140_v22  ;;  %709 = vmatpush1.bf16.msra.mxu1 %v1141_v23  ;;  %v1180_v57 = vld [vmem:[%s1955_s1 + $0x16c] ss:$16 sps:$4 sm:$0xff]   ;;  %v106_v61 = vmax.f32 %v104_v56, %v32_v54  ;;  %v1183_v1 = vld [vmem:[%s1955_s1 + $0x168] ss:$16 sps:$4 sm:$0xff]  }
  0x18   :  { %669 = vmatprep.subr.bf16.mxu0 %v1142_v24  ;;  %710 = vmatprep.subr.bf16.mxu1 %v1144_v25  ;;  %v34_v58 = vld [vmem:[%s1954_s0 + $0xc8] sm:$0xff]  ;;  %v143_v22 = vld [vmem:[%s1954_s0 + $0x98] sm:$0xff]  ;;  %v215_v24 = vmax.f32 %v135_v16, %v139_v18  ;;  %v33_v16 = vld [vmem:[%s1954_s0 + $0xc0] sm:$0xff] }
  0x19   :  { %v36_v59 = vld [vmem:[%s1954_s0 + $0xe8] sm:$0xff]  ;;  %v107_v3 = vmax.f32 %v105_v60, %v34_v58  ;;  %v145_v23 = vld [vmem:[%s1954_s0 + $0xb8] sm:$0xff] }
  0x1a   :  { %v38_v62 = vld [vmem:[%s1954_s0 + $0x108] sm:$0xff]  ;;  %v108_v4 = vmax.f32 %v106_v61, %v36_v59  ;;  %v155_v49 = vld [vmem:[%s1954_s0 + $0x158] sm:$0xff] }
  0x1b   :  { %670 = vmatpush1.bf16.msra.mxu0 %v1146_v26  ;;  %711 = vmatpush1.bf16.msra.mxu1 %v1147_v27  ;;  %v40_v63 = vld [vmem:[%s1954_s0 + $0x128] sm:$0xff]  ;;  %v109_v12 = vmax.f32 %v107_v3, %v38_v62  ;;  %v147_v27 = vld [vmem:[%s1954_s0 + $0xd8] sm:$0xff]  ;;  %v21_v62 = vld [vmem:[%s1954_s0] sm:$0xff] }
  0x1c   :  { %671 = vmatprep.subr.bf16.mxu0 %v1148_v28  ;;  %712 = vmatprep.subr.bf16.mxu1 %v1150_v29  ;;  %v1186_v5 = vld [vmem:[%s1955_s1 + $0x14c] ss:$16 sps:$4 sm:$0xff]   ;;  %v1189_v9 = vld [vmem:[%s1955_s1 + $0x148] ss:$16 sps:$4 sm:$0xff]   ;;  %v110_v13 = vmax.f32 %v108_v4, %v40_v63  ;;  %v216_v28 = vmax.f32 %v137_v17, %v141_v21  ;;  %v1194_v29 = vld [vmem:[%s1955_s1 + $0x120] ss:$16 sps:$4 sm:$0xff]  }
  0x1d   :  { %v42_v6 = vld [vmem:[%s1954_s0 + $0x148] sm:$0xff]  ;;  %v157_v56 = vld [vmem:[%s1954_s0 + $0x178] sm:$0xff]  ;;  %v23_v63 = vld [vmem:[%s1954_s0 + $0x20] sm:$0xff] }
  0x1e   :  { %v44_v7 = vld [vmem:[%s1954_s0 + $0x168] sm:$0xff]  ;;  %v111_v19 = vmax.f32 %v109_v12, %v42_v6  ;;  %v161_v60 = vld [vmem:[%s1954_s0 + $0x1b8] sm:$0xff]  ;;  %v25_v3 = vld [vmem:[%s1954_s0 + $0x40] sm:$0xff] }
  0x1f   :  { %672 = vmatpush1.bf16.msra.mxu0 %v1152_v30  ;;  %713 = vmatpush1.bf16.msra.mxu1 %v1153_v31  ;;  %v46_v10 = vld [vmem:[%s1954_s0 + $0x188] sm:$0xff]  ;;  %v112_v20 = vmax.f32 %v110_v13, %v44_v7  ;;  %v27_v4 = vld [vmem:[%s1954_s0 + $0x60] sm:$0xff]  ;;  %v163_v7 = vld [vmem:[%s1954_s0 + $0x1d8] sm:$0xff] }
  0x20   :  { %673 = vmatprep.subr.bf16.mxu0 %v1154_v32  ;;  %714 = vmatprep.subr.bf16.mxu1 %v1156_v33  ;;  %v48_v11 = vld [vmem:[%s1954_s0 + $0x1a8] sm:$0xff]  ;;  %v113_v31 = vmax.f32 %v111_v19, %v46_v10  ;;  %v149_v33 = vld [vmem:[%s1954_s0 + $0xf8] sm:$0xff]  ;;  %v71_v10 = vmax.f32 %v21_v62, %v25_v3  ;;  %v35_v17 = vld [vmem:[%s1954_s0 + $0xe0] sm:$0xff] }
  0x21   :  { %v1192_v15 = vld [vmem:[%s1955_s1 + $0x12c] ss:$16 sps:$4 sm:$0xff]   ;;  %v1195_v30 = vld [vmem:[%s1955_s1 + $0x128] ss:$16 sps:$4 sm:$0xff]   ;;  %v114_v32 = vmax.f32 %v112_v20, %v48_v11  ;;  %v72_v11 = vmax.f32 %v23_v63, %v27_v4  ;;  %v49_v63 = vld [vmem:[%s1954_s0 + $0x1c0] sm:$0xff] }
  0x22   :  { %v50_v25 = vld [vmem:[%s1954_s0 + $0x1c8] sm:$0xff]  ;;  %v167_v19 = vld [vmem:[%s1954_s0 + $0x218] sm:$0xff] }
  0x23   :  { %674 = vmatpush2.bf16.msra.mxu0 %v1158_v34  ;;  %715 = vmatpush2.bf16.msra.mxu1 %v1159_v35  ;;  %v52_v26 = vld [vmem:[%s1954_s0 + $0x1e8] sm:$0xff]  ;;  %v217_v34 = vmax.f32 %v215_v24, %v143_v22  ;;  %v1196_v35 = vld [vmem:[%s1955_s1 + $0x104] ss:$16 sps:$4 sm:$0xff]  }
  0x24   :  { %675 = vmatprep.subr.bf16.mxu0 %v1160_v36  ;;  %716 = vmatprep.subr.bf16.mxu1 %v1162_v37  ;;  %v1198_v36 = vld [vmem:[%s1955_s1 + $0x10c] ss:$16 sps:$4 sm:$0xff]   ;;  %v70_v53 = vld [vmem:[%s1954_s0 + $0x308] sm:$0xf] }
  0x25   :  { %v54_v37 = vld [vmem:[%s1954_s0 + $0x208] sm:$0xff]  ;;  %v125_v18 = vsel %vm93_vm0, %v70_v53, -inf  ;;  %v181_v53 = vld [vmem:[%s1954_s0 + $0x2f8] sm:$0xff] }
  0x26   :  { %v64_v48 = vld [vmem:[%s1954_s0 + $0x2a8] sm:$0xff] }
  0x27   :  { %676 = vmatpush2.bf16.msra.mxu0 %v1164_v38  ;;  %717 = vmatpush2.bf16.msra.mxu1 %v1165_v39  ;;  %v56_v38 = vld [vmem:[%s1954_s0 + $0x228] sm:$0xff]  ;;  %v151_v39 = vld [vmem:[%s1954_s0 + $0x118] sm:$0xff] }
  0x28   :  { %677 = vmatprep.subr.bf16.mxu0 %v1166_v40  ;;  %718 = vmatprep.subr.bf16.mxu1 %v1168_v41  ;;  %v218_v40 = vmax.f32 %v216_v28, %v145_v23  ;;  %v58_v41 = vld [vmem:[%s1954_s0 + $0x248] sm:$0xff]  ;;  %v39_v28 = vld [vmem:[%s1954_s0 + $0x120] sm:$0xff] }
  0x29   :  { %v66_v59 = vld [vmem:[%s1954_s0 + $0x2c8] sm:$0xff] }
  0x2a   :  { %v220_v50 = vmax.f32 %v218_v40, %v149_v33  ;;  %v68_v6 = vld [vmem:[%s1954_s0 + $0x2e8] sm:$0xff]  ;;  %v43_v40 = vld [vmem:[%s1954_s0 + $0x160] sm:$0xff] }
  0x2b   :  { %678 = vmatpush2.bf16.msra.mxu0 %v1170_v42  ;;  %719 = vmatpush2.bf16.msra.mxu1 %v1171_v43  ;;  %v60_v42 = vld [vmem:[%s1954_s0 + $0x268] sm:$0xff]  ;;  %v115_v43 = vmax.f32 %v113_v31, %v50_v25  ;;  %v169_v25 = vld [vmem:[%s1954_s0 + $0x238] sm:$0xff] }
  0x2c   :  { %679 = vmatprep.subr.bf16.mxu0 %v1172_v44  ;;  %720 = vmatprep.subr.bf16.mxu1 %v1174_v45  ;;  %v116_v44 = vmax.f32 %v114_v32, %v52_v26  ;;  %v153_v45 = vld [vmem:[%s1954_s0 + $0x138] sm:$0xff] }
  0x2d   :  { %v117_v54 = vmax.f32 %v115_v43, %v54_v37  ;;  %v222_v61 = vmax.f32 %v220_v50, %v153_v45  ;;  %v175_v31 = vld [vmem:[%s1954_s0 + $0x298] sm:$0xff]  ;;  %v45_v43 = vld [vmem:[%s1954_s0 + $0x180] sm:$0xff]  ;;  %v136_v50 = vld [vmem:[%s1954_s0 + $0x30] sm:$0xff] }
  0x2e   :  { %v118_v55 = vmax.f32 %v116_v44, %v56_v38  ;;  %v183_v37 = vld [vmem:[%s1954_s0 + $0x318] sm:$0xf]  ;;  %v47_v44 = vld [vmem:[%s1954_s0 + $0x1a0] sm:$0xff] }
  0x2f   :  { %680 = vmatpush2.bf16.msra.mxu0 %v1176_v46  ;;  %721 = vmatpush2.bf16.msra.mxu1 %v1177_v47  ;;  %v219_v46 = vmax.f32 %v217_v34, %v147_v27  ;;  %v62_v47 = vld [vmem:[%s1954_s0 + $0x288] sm:$0xff]  ;;  %v37_v27 = vld [vmem:[%s1954_s0 + $0x100] sm:$0xff]  ;;  %v237_v62 = vsel %vm93_vm0, %v183_v37, -inf }
  0x30   :  { %681 = vmatprep.subr.bf16.mxu0 %v1178_v52  ;;  %722 = vmatprep.subr.bf16.mxu1 %v1180_v57  ;;  %v1201_v52 = vld [vmem:[%s1955_s1 + $0x108] ss:$16 sps:$4 sm:$0xff]  }
  0x31   :  { %v159_v57 = vld [vmem:[%s1954_s0 + $0x198] sm:$0xff]  ;;  %v221_v58 = vmax.f32 %v219_v46, %v151_v39  ;;  %v41_v39 = vld [vmem:[%s1954_s0 + $0x140] sm:$0xff] }
  0x33   :  { %682 = vmatpush2.bf16.msra.mxu0 %v1182_v0  ;;  %723 = vmatpush2.bf16.msra.mxu1 %v1183_v1  ;;  %v119_v0 = vmax.f32 %v117_v54, %v58_v41  ;;  %v120_v1 = vmax.f32 %v118_v55, %v60_v42  ;;  %v179_v41 = vld [vmem:[%s1954_s0 + $0x2d8] sm:$0xff] }
  0x34   :  { %683 = vmatprep.subr.bf16.mxu0 %v1184_v2  ;;  %724 = vmatprep.subr.bf16.mxu1 %v1186_v5  ;;  %v223_v2 = vmax.f32 %v221_v58, %v155_v49  ;;  %v29_v5 = vld [vmem:[%s1954_s0 + $0x80] sm:$0xff]  ;;  %v144_v58 = vld [vmem:[%s1954_s0 + $0xb0] sm:$0xff] }
  0x35   :  { %v121_v12 = vmax.f32 %v119_v0, %v62_v47  ;;  %v122_v13 = vmax.f32 %v120_v1, %v64_v48  ;;  %v73_v21 = vmax.f32 %v71_v10, %v29_v5  ;;  %v134_v47 = vld [vmem:[%s1954_s0 + $0x10] sm:$0xff]  ;;  %v51_v0 = vld [vmem:[%s1954_s0 + $0x1e0] sm:$0xff] }
  0x36   :  { %v146_v1 = vld [vmem:[%s1954_s0 + $0xd0] sm:$0xff]  ;;  %v53_v10 = vld [vmem:[%s1954_s0 + $0x200] sm:$0xff] }
  0x37   :  { %684 = vmatpush2.bf16.msra.mxu0 %v1188_v8  ;;  %725 = vmatpush2.bf16.msra.mxu1 %v1189_v9  ;;  %v224_v8 = vmax.f32 %v222_v61, %v157_v56  ;;  %v31_v9 = vld [vmem:[%s1954_s0 + $0xa0] sm:$0xff]  ;;  %v123_v23 = vmax.f32 %v121_v12, %v66_v59  ;;  %v124_v24 = vmax.f32 %v122_v13, %v68_v6  ;;  %v148_v6 = vld [vmem:[%s1954_s0 + $0xf0] sm:$0xff] }
  0x38   :  { %685 = vmatprep.subr.bf16.mxu0 %v1190_v14  ;;  %726 = vmatprep.subr.bf16.mxu1 %v1192_v15  ;;  %v165_v14 = vld [vmem:[%s1954_s0 + $0x1f8] sm:$0xff]  ;;  %v225_v15 = vmax.f32 %v223_v2, %v159_v57  ;;  %v74_v22 = vmax.f32 %v72_v11, %v31_v9  ;;  %v75_v33 = vmax.f32 %v73_v21, %v33_v16  ;;  %v142_v57 = vld [vmem:[%s1954_s0 + $0x90] sm:$0xff]  ;;  %v55_v11 = vld [vmem:[%s1954_s0 + $0x220] sm:$0xff] }
  0x39   :  { %v226_v20 = vmax.f32 %v224_v8, %v161_v60  ;;  %v150_v12 = vld [vmem:[%s1954_s0 + $0x110] sm:$0xff]  ;;  %v57_v21 = vld [vmem:[%s1954_s0 + $0x240] sm:$0xff] }
  0x3a   :  { %v227_v26 = vmax.f32 %v225_v15, %v163_v7  ;;  %v76_v34 = vmax.f32 %v74_v22, %v35_v17  ;;  %v77_v45 = vmax.f32 %v75_v33, %v37_v27  ;;  %v152_v17 = vld [vmem:[%s1954_s0 + $0x130] sm:$0xff]  ;;  %v59_v22 = vld [vmem:[%s1954_s0 + $0x260] sm:$0xff] }
  0x3b   :  { %686 = vmatpush2.bf16.msra.mxu0 %v1194_v29  ;;  %727 = vmatpush2.bf16.msra.mxu1 %v1195_v30  ;;  %v171_v29 = vld [vmem:[%s1954_s0 + $0x258] sm:$0xff]  ;;  %v228_v32 = vmax.f32 %v226_v20, %v165_v14 }
  0x3c   :  { %687 = vmatprep.subr.bf16.mxu0 %v1196_v35  ;;  %728 = vmatprep.subr.bf16.mxu1 %v1198_v36  ;;  %v173_v30 = vld [vmem:[%s1954_s0 + $0x278] sm:$0xff]  ;;  %v126_v35 = vmax.f32 %v123_v23, %v125_v18  ;;  %v229_v38 = vmax.f32 %v227_v26, %v167_v19  ;;  %v78_v46 = vmax.f32 %v76_v34, %v39_v28  ;;  %v154_v23 = vld [vmem:[%s1954_s0 + $0x150] sm:$0xff]  ;;  %v63_v26 = vld [vmem:[%s1954_s0 + $0x2a0] sm:$0xff] }
  0x3d   :  { %v177_v36 = vld [vmem:[%s1954_s0 + $0x2b8] sm:$0xff]  ;;  %v230_v42 = vmax.f32 %v228_v32, %v169_v25  ;;  %v79_v55 = vmax.f32 %v77_v45, %v41_v39  ;;  %v61_v25 = vld [vmem:[%s1954_s0 + $0x280] sm:$0xff]  ;;  %v158_v32 = vld [vmem:[%s1954_s0 + $0x190] sm:$0xff] }
  0x3e   :  { %v127_v48 = vmax.f32 %v126_v35, %v124_v24  ;;  %v231_v49 = vmax.f32 %v229_v38, %v171_v29  ;;  %v80_v56 = vmax.f32 %v78_v46, %v43_v40  ;;  %v156_v29 = vld [vmem:[%s1954_s0 + $0x170] sm:$0xff]  ;;  %v774_v34 = vld [vmem:[%s1957_s3 + $0xf8] sm:$0xff] }
  0x3f   :  { %688 = vmatpush2.bf16.msra.mxu0 %v1200_v51  ;;  %729 = vmatpush2.bf16.msra.mxu1 %v1201_v52  ;;  %v138_v51 = vld [vmem:[%s1954_s0 + $0x50] sm:$0xff]  ;;  %v232_v54 = vmax.f32 %v230_v42, %v173_v30  ;;  %v81_v4 = vmax.f32 %v79_v55, %v45_v43  ;;  %v806_v35 = vld [vmem:[%s1957_s3 + $0x1f8] sm:$0xff]  ;;  %v65_v43 = vld [vmem:[%s1954_s0 + $0x2c0] sm:$0xff] }
  0x40   :  { %v140_v52 = vld [vmem:[%s1954_s0 + $0x70] sm:$0xff]  ;;  %v184_v59 = vmax.f32 %v134_v47, %v138_v51  ;;  %v128_v60 = vrot.slane %v127_v48, 4  ;;  %v233_v61 = vmax.f32 %v231_v49, %v175_v31  ;;  %v82_v5 = vmax.f32 %v80_v56, %v47_v44  ;;  %1035 = vmatprep.subr.mxu0 %v774_v34  ;;  %1070 = vmatprep.subr.mxu1 %v806_v35  ;;  %v67_v44 = vld [vmem:[%s1954_s0 + $0x2e0] sm:$0xff] }
  0x41   :  { %v185_v2 = vmax.f32 %v136_v50, %v140_v52  ;;  %v234_v3 = vmax.f32 %v232_v54, %v177_v36  ;;  %v83_v15 = vmax.f32 %v81_v4, %v49_v63  ;;  %v69_v36 = vld [vmem:[%s1954_s0 + $0x300] sm:$0xf]  ;;  %v160_v39 = vld [vmem:[%s1954_s0 + $0x1b0] sm:$0xff] }
  0x42   :  { %v186_v7 = vmax.f32 %v184_v59, %v142_v57  ;;  %v129_v8 = vmax.f32 %v127_v48, %v128_v60  ;;  %v235_v9 = vmax.f32 %v233_v61, %v179_v41  ;;  %v84_v16 = vmax.f32 %v82_v5, %v51_v0  ;;  %v162_v45 = vld [vmem:[%s1954_s0 + $0x1d0] sm:$0xff] }
  0x43   :  { %v187_v13 = vmax.f32 %v185_v2, %v144_v58  ;;  %v236_v14 = vmax.f32 %v234_v3, %v181_v53  ;;  %v85_v27 = vmax.f32 %v83_v15, %v53_v10  ;;  %v164_v49 = vld [vmem:[%s1954_s0 + $0x1f0] sm:$0xff]  ;;  %v94_v52 = vsel %vm93_vm0, %v69_v36, -inf }
  0x44   :  { %v188_v18 = vmax.f32 %v186_v7, %v146_v1  ;;  %v130_v19 = vrot.slane %v129_v8, 2  ;;  %v238_v20 = vmax.f32 %v235_v9, %v237_v62  ;;  %v86_v28 = vmax.f32 %v84_v16, %v55_v11  ;;  %v166_v53 = vld [vmem:[%s1954_s0 + $0x210] sm:$0xff] }
  0x45   :  { %v189_v24 = vmax.f32 %v187_v13, %v148_v6  ;;  %v87_v37 = vmax.f32 %v85_v27, %v57_v21  ;;  %v168_v57 = vld [vmem:[%s1954_s0 + $0x230] sm:$0xff] }
  0x46   :  { %v190_v30 = vmax.f32 %v188_v18, %v150_v12  ;;  %v239_v31 = vmax.f32 %v238_v20, %v236_v14  ;;  %v88_v38 = vmax.f32 %v86_v28, %v59_v22  ;;  %v131_v41 = vmax.f32 %v129_v8, %v130_v19  ;;  %v170_v61 = vld [vmem:[%s1954_s0 + $0x250] sm:$0xff] }
  0x47   :  { %v191_v33 = vmax.f32 %v189_v24, %v152_v17  ;;  %v89_v47 = vmax.f32 %v87_v37, %v61_v25  ;;  %v172_v0 = vld [vmem:[%s1954_s0 + $0x270] sm:$0xff] }
  0x48   :  { %v192_v40 = vmax.f32 %v190_v30, %v154_v23  ;;  %v240_v42 = vrot.slane %v239_v31, 4  ;;  %v90_v48 = vmax.f32 %v88_v38, %v63_v26  ;;  %v132_v59 = vrot.slane %v131_v41, 1  ;;  %v174_v3 = vld [vmem:[%s1954_s0 + $0x290] sm:$0xff] }
  0x49   :  { %v193_v46 = vmax.f32 %v191_v33, %v156_v29  ;;  %v91_v55 = vmax.f32 %v89_v47, %v65_v43  ;;  %v176_v6 = vld [vmem:[%s1954_s0 + $0x2b0] sm:$0xff] }
  0x4a   :  { %v194_v50 = vmax.f32 %v192_v40, %v158_v32  ;;  %v241_v51 = vmax.f32 %v239_v31, %v240_v42  ;;  %v92_v56 = vmax.f32 %v90_v48, %v67_v44  ;;  %v182_v7 = vld [vmem:[%s1954_s0 + $0x310] sm:$0xf]  ;;  %v133_v9 = vmax.f32 %v131_v41, %v132_v59 }
  0x4b   :  { %v195_v54 = vmax.f32 %v193_v46, %v160_v39  ;;  %v95_v63 = vmax.f32 %v91_v55, %v94_v52  ;;  %v178_v11 = vld [vmem:[%s1954_s0 + $0x2d0] sm:$0xff]  ;;  %v206_v18 = vsel %vm93_vm0, %v182_v7, -inf }
  0x4c   :  { %v196_v58 = vmax.f32 %v194_v50, %v162_v45  ;;  %v242_v60 = vrot.slane %v241_v51, 2  ;;  %v180_v14 = vld [vmem:[%s1954_s0 + $0x2f0] sm:$0xff] }
  0x4d   :  { %v197_v62 = vmax.f32 %v195_v54, %v164_v49  ;;  %v96_v5 = vmax.f32 %v95_v63, %v92_v56 }
  0x4e   :  { %v198_v1 = vmax.f32 %v196_v58, %v166_v53  ;;  %v243_v2 = vmax.f32 %v241_v51, %v242_v60 }
  0x4f   :  { %v199_v4 = vmax.f32 %v197_v62, %v168_v57  ;;  %v97_v13 = vrot.slane %v96_v5, 4 }
  0x50   :  { %v200_v8 = vmax.f32 %v198_v1, %v170_v61  ;;  %v244_v10 = vrot.slane %v243_v2, 1 }
  0x51   :  { %v201_v12 = vmax.f32 %v199_v4, %v172_v0  ;;  %v98_v19 = vmax.f32 %v96_v5, %v97_v13 }
  0x52   :  { %v202_v15 = vmax.f32 %v200_v8, %v174_v3  ;;  %v245_v16 = vmax.f32 %v243_v2, %v244_v10 }
  0x53   :  { %v203_v17 = vmax.f32 %v201_v12, %v176_v6  ;;  %v99_v24 = vrot.slane %v98_v19, 2 }
  0x54   :  { %v204_v20 = vmax.f32 %v202_v15, %v178_v11  ;;  %v248_v21 = vsel %vm246_vm1, %v133_v9, %v245_v16 }
  0x55   :  { %v205_v22 = vmax.f32 %v203_v17, %v180_v14  ;;  %v250_v23 = vpack.c.bf16 %v248_v21, %v248_v21 }
  0x56   :  { %v207_v25 = vmax.f32 %v204_v20, %v206_v18 }
  0x57   :  { %10 = vsyncpa [#allocation3], 0  ;;  %689 = vmatprep.mubr.bf16.mxu0 %v250_v23  ;;  %730 = vmatprep.mubr.bf16.mxu1 %v250_v23  ;;  %v100_v27 = vmax.f32 %v98_v19, %v99_v24  ;;  %v758_v38 = vld [vmem:[%s1957_s3 + $0x78] sm:$0xff]  ;;  %v773_v40 = vld [vmem:[%s1957_s3 + $0xf0] sm:$0xff]  ;;  %s1224_s11 = smov [#allocation2]   ;;  %vm954_vm2 = vcmask 58368  }
  0x58   :  { %v208_v26 = vmax.f32 %v207_v25, %v205_v22  ;;  %v790_v39 = vld [vmem:[%s1957_s3 + $0x178] sm:$0xff]  ;;  %v805_v41 = vld [vmem:[%s1957_s3 + $0x1f0] sm:$0xff]  ;;  %v772_v44 = vld [vmem:[%s1957_s3 + $0xe8] sm:$0xff]  ;;  %s962_s12 = sshll.u32 %s1224_s11, 4  ;;  %s963_s12 = int_to_ptr.vmem [resolvable:$true] %s962_s12 }
  0x59   :  { %v101_v30 = vrot.slane %v100_v27, 1  ;;  %v757_v42 = vld [vmem:[%s1957_s3 + $0x70] sm:$0xff]  ;;  %v804_v45 = vld [vmem:[%s1957_s3 + $0x1e8] sm:$0xff]  ;;  %v771_v48 = vld [vmem:[%s1957_s3 + $0xe0] sm:$0xff]  ;;  %s1202_s13 = scalar_lea.vmem %s963_s12, 32  ;;  %p1207_p1 = scmp.lt.s32.totalorder %s963_s12, %s963_s12 }
  0x5a   :  { %v209_v28 = vrot.slane %v208_v26, 4  ;;  %v789_v43 = vld [vmem:[%s1957_s3 + $0x170] sm:$0xff]  ;;  %v756_v46 = vld [vmem:[%s1957_s3 + $0x68] sm:$0xff]  ;;  %v803_v49 = vld [vmem:[%s1957_s3 + $0x1e0] sm:$0xff]  ;;  %p1203_p0 = scmp.ne.s32.totalorder %s963_s12, %s1202_s13  ;;  %p1208_p2 = scmp.lt.s32.totalorder %s1202_s13, %s1202_s13 }
  0x5b   :  { %v102_v33 = vmax.f32 %v100_v27, %v101_v30  ;;  %v788_v47 = vld [vmem:[%s1957_s3 + $0x168] sm:$0xff]  ;;  %v755_v50 = vld [vmem:[%s1957_s3 + $0x60] sm:$0xff]  ;;  %v770_v52 = vld [vmem:[%s1957_s3 + $0xd8] sm:$0xff] }
  0x5c   :  { %v210_v29 = vmax.f32 %v208_v26, %v209_v28  ;;  %v787_v51 = vld [vmem:[%s1957_s3 + $0x160] sm:$0xff]  ;;  %v802_v53 = vld [vmem:[%s1957_s3 + $0x1d8] sm:$0xff]  ;;  %v769_v56 = vld [vmem:[%s1957_s3 + $0xd0] sm:$0xff]  ;;  %p1209_p3 = por %p1208_p2, %p1207_p1 }
  0x5d   :  { %v754_v54 = vld [vmem:[%s1957_s3 + $0x58] sm:$0xff]  ;;  %v801_v57 = vld [vmem:[%s1957_s3 + $0x1d0] sm:$0xff]  ;;  %v768_v60 = vld [vmem:[%s1957_s3 + $0xc8] sm:$0xff] }
  0x5e   :  { %v211_v31 = vrot.slane %v210_v29, 2  ;;  %v786_v55 = vld [vmem:[%s1957_s3 + $0x158] sm:$0xff]  ;;  %v753_v58 = vld [vmem:[%s1957_s3 + $0x50] sm:$0xff]  ;;  %v800_v61 = vld [vmem:[%s1957_s3 + $0x1c8] sm:$0xff]  ;;  %p1210_p4 = pnand %p1209_p3, %p1203_p0 }
  0x5f   :  { %v785_v59 = vld [vmem:[%s1957_s3 + $0x150] sm:$0xff]  ;;  %v752_v62 = vld [vmem:[%s1957_s3 + $0x48] sm:$0xff]  ;;  %v767_v0 = vld [vmem:[%s1957_s3 + $0xc0] sm:$0xff] }
  0x60   :  { %v212_v32 = vmax.f32 %v210_v29, %v211_v31  ;;  %v784_v63 = vld [vmem:[%s1957_s3 + $0x148] sm:$0xff]  ;;  %v799_v1 = vld [vmem:[%s1957_s3 + $0x1c0] sm:$0xff]  ;;  %v766_v4 = vld [vmem:[%s1957_s3 + $0xb8] sm:$0xff] }
  0x61   :  { %v751_v2 = vld [vmem:[%s1957_s3 + $0x40] sm:$0xff]  ;;  %v798_v5 = vld [vmem:[%s1957_s3 + $0x1b8] sm:$0xff]  ;;  %v765_v8 = vld [vmem:[%s1957_s3 + $0xb0] sm:$0xff] }
  0x62   :  { %v213_v34 = vrot.slane %v212_v32, 1  ;;  %v783_v3 = vld [vmem:[%s1957_s3 + $0x140] sm:$0xff]  ;;  %v750_v6 = vld [vmem:[%s1957_s3 + $0x38] sm:$0xff]  ;;  %v797_v9 = vld [vmem:[%s1957_s3 + $0x1b0] sm:$0xff] }
  0x63   :  { %v782_v7 = vld [vmem:[%s1957_s3 + $0x138] sm:$0xff]  ;;  %v749_v10 = vld [vmem:[%s1957_s3 + $0x30] sm:$0xff]  ;;  %v764_v12 = vld [vmem:[%s1957_s3 + $0xa8] sm:$0xff] }
  0x64   :  { %v214_v35 = vmax.f32 %v212_v32, %v213_v34  ;;  %v781_v11 = vld [vmem:[%s1957_s3 + $0x130] sm:$0xff]  ;;  %v796_v13 = vld [vmem:[%s1957_s3 + $0x1a8] sm:$0xff]  ;;  %v763_v16 = vld [vmem:[%s1957_s3 + $0xa0] sm:$0xff] }
  0x65   :  { %v748_v14 = vld [vmem:[%s1957_s3 + $0x28] sm:$0xff]  ;;  %v795_v17 = vld [vmem:[%s1957_s3 + $0x1a0] sm:$0xff]  ;;  %v762_v20 = vld [vmem:[%s1957_s3 + $0x98] sm:$0xff] }
  0x66   :  { %v247_v36 = vsel %vm246_vm1, %v102_v33, %v214_v35  ;;  %v780_v15 = vld [vmem:[%s1957_s3 + $0x128] sm:$0xff]  ;;  %v747_v18 = vld [vmem:[%s1957_s3 + $0x20] sm:$0xff]  ;;  %v794_v21 = vld [vmem:[%s1957_s3 + $0x198] sm:$0xff] }
  0x67   :  { %v249_v37 = vpack.c.bf16 %v247_v36, %v247_v36  ;;  %v779_v19 = vld [vmem:[%s1957_s3 + $0x120] sm:$0xff]  ;;  %v746_v22 = vld [vmem:[%s1957_s3 + $0x18] sm:$0xff]  ;;  %v761_v24 = vld [vmem:[%s1957_s3 + $0x90] sm:$0xff]  ;;  %v317_v36 = vlaneseq }
  0x68   :  { %v778_v23 = vld [vmem:[%s1957_s3 + $0x118] sm:$0xff]  ;;  %v793_v25 = vld [vmem:[%s1957_s3 + $0x190] sm:$0xff]  ;;  %v760_v28 = vld [vmem:[%s1957_s3 + $0x88] sm:$0xff] }
  0x69   :  { %690 = vmatmul.mubr.bf16.vlgmr.msra.gmra.mxu0 %v249_v37  ;;  %731 = vmatmul.mubr.bf16.vlgmr.msra.gmra.mxu1 %v249_v37  ;;  %v745_v26 = vld [vmem:[%s1957_s3 + $0x10] sm:$0xff]  ;;  %v792_v29 = vld [vmem:[%s1957_s3 + $0x188] sm:$0xff]  ;;  %v759_v32 = vld [vmem:[%s1957_s3 + $0x80] sm:$0xff]  ;;  %v318_v37 = vshrl.u32 %v317_v36, 7 }
  0x6a   :  { %1036 = vmatpush3.msra.mxu0 %v758_v38  ;;  %1071 = vmatpush3.msra.mxu1 %v790_v39  ;;  %v777_v27 = vld [vmem:[%s1957_s3 + $0x110] sm:$0xff]  ;;  %v744_v30 = vld [vmem:[%s1957_s3 + $0x8] sm:$0xff]  ;;  %v791_v33 = vld [vmem:[%s1957_s3 + $0x180] sm:$0xff] }
  0x6b   :  { %1037 = vmatprep.subr.mxu0 %v773_v40  ;;  %1072 = vmatprep.subr.mxu1 %v805_v41  ;;  %v776_v31 = vld [vmem:[%s1957_s3 + $0x108] sm:$0xff]  ;;  %v743_v34 = vld [vmem:[%s1957_s3] sm:$0xff]  ;;  %v327_v38 = vsub.s32 2, %v318_v37  ;;  %v319_v39 = vsub.s32 0, %v318_v37  ;;  %v323_v41 = vsub.s32 1, %v318_v37 }
  0x6c   :  { %1038 = vmatpush3.msra.mxu0 %v757_v42  ;;  %1073 = vmatpush3.msra.mxu1 %v789_v43  ;;  %v775_v35 = vld [vmem:[%s1957_s3 + $0x100] sm:$0xff]  ;;  %v331_v42 = vsub.s32 3, %v318_v37 }
  0x6d   :  { %1039 = vmatprep.subr.mxu0 %v772_v44  ;;  %1074 = vmatprep.subr.mxu1 %v804_v45  ;;  %v315_v40 = vld [vmem:[%s1956_s2] sm:$0xf] }
  0x6e   :  { %1040 = vmatpush3.msra.mxu0 %v756_v46  ;;  %1075 = vmatpush3.msra.mxu1 %v788_v47  ;;  %v328_v43 = vrot.slane %v315_v40, %v327_v38  ;;  %v320_v44 = vrot.slane %v315_v40, %v319_v39  ;;  %v324_v45 = vrot.slane %v315_v40, %v323_v41 }
  0x6f   :  { %1041 = vmatprep.subr.mxu0 %v771_v48  ;;  %1076 = vmatprep.subr.mxu1 %v803_v49  ;;  %v332_v46 = vrot.slane %v315_v40, %v331_v42 }
  0x70   :  { %1042 = vmatpush3.msra.mxu0 %v755_v50  ;;  %1077 = vmatpush3.msra.mxu1 %v787_v51 }
  0x71   :  { %1043 = vmatprep.subr.mxu0 %v770_v52  ;;  %1078 = vmatprep.subr.mxu1 %v802_v53 }
  0x72   :  { %1044 = vmatpush3.msra.mxu0 %v754_v54  ;;  %1079 = vmatpush3.msra.mxu1 %v786_v55 }
  0x73   :  { %1045 = vmatprep.subr.mxu0 %v769_v56  ;;  %1080 = vmatprep.subr.mxu1 %v801_v57 }
  0x74   :  { %1046 = vmatpush3.msra.mxu0 %v753_v58  ;;  %1081 = vmatpush3.msra.mxu1 %v785_v59 }
  0x75   :  { %1047 = vmatprep.subr.mxu0 %v768_v60  ;;  %1082 = vmatprep.subr.mxu1 %v800_v61 }
  0x76   :  { %1048 = vmatpush3.msra.mxu0 %v752_v62  ;;  %1083 = vmatpush3.msra.mxu1 %v784_v63 }
  0x77   :  { %1049 = vmatprep.subr.mxu0 %v767_v0  ;;  %1084 = vmatprep.subr.mxu1 %v799_v1  ;;  %v1034_v1 = vld [vmem:[%s1958_s4] ss:$0 sm:$0xff] }
  0x78   :  { %1050 = vmatpush3.msra.mxu0 %v751_v2  ;;  %1085 = vmatpush3.msra.mxu1 %v783_v3 }
  0x79   :  { %1051 = vmatprep.subr.mxu0 %v766_v4  ;;  %1086 = vmatprep.subr.mxu1 %v798_v5 }
  0x7a   :  { %1052 = vmatpush3.msra.mxu0 %v750_v6  ;;  %1087 = vmatpush3.msra.mxu1 %v782_v7 }
  0x7b   :  { %1053 = vmatprep.subr.mxu0 %v765_v8  ;;  %1088 = vmatprep.subr.mxu1 %v797_v9 }
  0x7c   :  { %1054 = vmatpush3.msra.mxu0 %v749_v10  ;;  %1089 = vmatpush3.msra.mxu1 %v781_v11 }
  0x7d   :  { %1055 = vmatprep.subr.mxu0 %v764_v12  ;;  %1090 = vmatprep.subr.mxu1 %v796_v13 }
  0x7e   :  { %1056 = vmatpush3.msra.mxu0 %v748_v14  ;;  %1091 = vmatpush3.msra.mxu1 %v780_v15 }
  0x7f   :  { %1057 = vmatprep.subr.mxu0 %v763_v16  ;;  %1092 = vmatprep.subr.mxu1 %v795_v17 }
  0x80   :  { %1058 = vmatpush3.msra.mxu0 %v747_v18  ;;  %1093 = vmatpush3.msra.mxu1 %v779_v19 }
  0x81   :  { %1059 = vmatprep.subr.mxu0 %v762_v20  ;;  %1094 = vmatprep.subr.mxu1 %v794_v21 }
  0x82   :  { %1060 = vmatpush3.msra.mxu0 %v746_v22  ;;  %1095 = vmatpush3.msra.mxu1 %v778_v23 }
  0x83   :  { %1061 = vmatprep.subr.mxu0 %v761_v24  ;;  %1096 = vmatprep.subr.mxu1 %v793_v25 }
  0x84   :  { %1062 = vmatpush3.msra.mxu0 %v745_v26  ;;  %1097 = vmatpush3.msra.mxu1 %v777_v27 }
  0x85   :  { %1063 = vmatprep.subr.mxu0 %v760_v28  ;;  %1098 = vmatprep.subr.mxu1 %v792_v29 }
  0x86   :  { %1064 = vmatpush3.msra.mxu0 %v744_v30  ;;  %1099 = vmatpush3.msra.mxu1 %v776_v31 }
  0x87   :  { %1065 = vmatprep.subr.mxu0 %v759_v32  ;;  %1100 = vmatprep.subr.mxu1 %v791_v33 }
  0x88   :  { %1066 = vmatpush3.msra.mxu0 %v743_v34  ;;  %1101 = vmatpush3.msra.mxu1 %v775_v35 }
 0x129   :  { %v691_v47 = vpop.f32.mrf.mxu0  ;;  %v732_v48 = vpop.f32.mrf.mxu1 }
 0x12a   :  { %v733_v49 = vadd.f32 %v732_v48, %v328_v43  ;;  %v692_v50 = vadd.f32 %v691_v47, %v320_v44 }
 0x12b   :  { %v693_v51 = vpop.f32.mrf.mxu0  ;;  %v734_v52 = vpop.f32.mrf.mxu1 }
 0x12c   :  { %v694_v53 = vadd.f32 %v693_v51, %v324_v45  ;;  %v735_v54 = vadd.f32 %v734_v52, %v332_v46  ;;  %v741_v55 = vmax.f32 %v733_v49, 0.0  ;;  %v739_v60 = vmax.f32 %v692_v50, 0.0 }
 0x12d   :  { %v695_v56 = vpop.f32.mrf.mxu0  ;;  %v736_v57 = vpop.f32.mrf.mxu1 }
 0x12e   :  { %v740_v58 = vmax.f32 %v694_v53, 0.0  ;;  %v742_v59 = vmax.f32 %v735_v54, 0.0 }
 0x12f   :  { %v696_v61 = vpop.f32.mrf.mxu0  ;;  %v737_v62 = vpop.f32.mrf.mxu1 }
 0x130   :  { %878 = vmatprep.mubr.f32.mxu0 %v740_v58  ;;  %948 = vmatprep.mubr.f32.mxu1 %v742_v59 }
 0x131   :  { %879 = vmatmul.mubr.f32.vlgmr.msra.gmra.mxu0 %v739_v60  ;;  %949 = vmatmul.mubr.f32.vlgmr.msra.gmra.mxu1 %v741_v55 }
 0x1f1   :  { %v1067_v63 = vpop.f32.mrf.mxu0  ;;  %v1102_v0 = vpop.f32.mrf.mxu1 }
 0x1f3   :  { %v1068_v2 = vpop.f32.mrf.mxu0  ;;  %v1103_v3 = vpop.f32.mrf.mxu1 }
 0x1f4   :  { %v1069_v4 = vadd.f32 %v1068_v2, %v1067_v63  ;;  %v1104_v6 = vadd.f32 %v1103_v3, %v1102_v0 }
 0x1f6   :  { %v881_v5 = vadd.f32 %v1069_v4, %v1034_v1 }
 0x1f8   :  { %v951_v7 = vadd.f32 %v1104_v6, %v881_v5 }
 0x1fa   :  { %955 = vst.msk [vmem:[#allocation2] sm:$0x3] %vm954_vm2, %v951_v7 }
 0x1fb   :  { %1213 = shalt.err (!%p1210_p4)
}
 0x1fc   :  { %965 = dma.vmem_to_hbm [thread:$0]  %s963_s12, 32, %s1959_s5, [#allocation3]  }
 0x1fd   :  { %1222 = dma.done.wait [#allocation3], 32  }
 0x1fe   :  { %1223 = vsyncadd [#allocation3], 4294967264 }
 0x1ff   :  { %969 = vsyncpa [#allocation3], 1 }

</bundles_post_ra>
